<compile_context>
chip_gen: v6e
topology: v6e:2x2x1
jax: 0.10.0
libtpu: 0.0.40
codegen_flags: <defaults>
</compile_context>

<pallas_src>
import jax
import jax.numpy as jnp
from jax.experimental import pallas as pl
from jax.experimental.pallas import tpu as pltpu

EPS = 1e-5


def _layer_norm(v, w):  # v: (R, C) fp32, w: (1, C) fp32 ; bias=False, eps=1e-5
    mu = jnp.mean(v, axis=-1, keepdims=True)
    var = jnp.mean(jnp.square(v - mu), axis=-1, keepdims=True)
    return (v - mu) * jax.lax.rsqrt(var + EPS) * w


def _make_kernel(batch_block: int, seq: int, num_heads: int, dim_head: int,
                 compute_dtype):
    Bb, T, H, D = batch_block, seq, num_heads, dim_head
    C = H * D
    R = Bb * T
    # approx reciprocal (EUP vrcp) only on the bf16 path, where bf16 already dominates
    # the error and the EUP slot is free.
    approx_recip = (compute_dtype != jnp.float32)

    def kernel(x_ref, ln1_ref, wqkv_ref, wo_ref, bo_ref,
               ln2_ref, w1_ref, b1_ref, w2_ref, b2_ref, o_ref):
        x = x_ref[...].astype(jnp.float32)                       # (R, C) flattened rows

        # ---- LayerNorm 1 (fp32) ----
        h1 = _layer_norm(x, ln1_ref[...])
        h1c = h1.astype(compute_dtype)

        # ---- fused QKV: one (R, C) x (C, 3C) MXU pass; q-scale folded into weights ----
        qkv = jnp.dot(h1c, wqkv_ref[...], preferred_element_type=jnp.float32)
        q3 = qkv[:, :C].reshape(Bb, T, C)                        # leading-dim split only
        k3 = qkv[:, C:2 * C].reshape(Bb, T, C)
        v3 = qkv[:, 2 * C:].reshape(Bb, T, C)

        # ---- attention: per head, batched over the batch dim.  The output projection
        #      is fused into the loop so the accumulator stays lane-dense (R, C) fp32 —
        #      no scratch, no masked D-wide partial stores, no readback. ----
        # TODO(synk): flash-style KV tiling (running max/sum) for T >~ 2k; the full
        #             (Bb, T, T) scores blow the v7x 64 MiB VMEM budget at large T.
        # TODO(synk): for realistic H (>= 8) switch this static Python loop to a
        #             lax.fori_loop over heads to bound live ranges / vreg pressure.
        acc = jnp.zeros((R, C), jnp.float32)
        for h in range(H):
            lo = h * D
            qh = q3[:, :, lo:lo + D].astype(compute_dtype)       # (Bb, T, D)
            kh = k3[:, :, lo:lo + D].astype(compute_dtype)
            vh = v3[:, :, lo:lo + D].astype(compute_dtype)
            s = jnp.einsum('bid,bjd->bij', qh, kh,
                           preferred_element_type=jnp.float32)   # (Bb, T, T) fp32
            s = s - jnp.max(s, axis=-1, keepdims=True)
            p = jnp.exp(s)
            p = p * pl.reciprocal(jnp.sum(p, axis=-1, keepdims=True),
                                  approx=approx_recip)
            yh = jnp.einsum('bij,bjd->bid', p.astype(compute_dtype), vh,
                            preferred_element_type=jnp.float32)  # (Bb, T, D) fp32
            acc = acc + jnp.dot(yh.reshape(R, D).astype(compute_dtype),
                                wo_ref[lo:lo + D, :],
                                preferred_element_type=jnp.float32)

        x2 = x + acc + bo_ref[...]

        # ---- LayerNorm 2 + MLP (the module's MLP residual is on its input h2) ----
        h2 = _layer_norm(x2, ln2_ref[...])
        h2c = h2.astype(compute_dtype)
        z = jnp.maximum(
            jnp.dot(h2c, w1_ref[...], preferred_element_type=jnp.float32) + b1_ref[...],
            0.0)
        m = jnp.dot(z.astype(compute_dtype), w2_ref[...],
                    preferred_element_type=jnp.float32) + b2_ref[...]

        o_ref[...] = (x2 + h2 + m).astype(o_ref.dtype)

    return kernel


def _vmem_bytes_estimate(bb, T, C, H, mlp_dim, x_itemsize, w_bytes):
    """Conservative per-grid-step VMEM footprint estimate (bytes)."""
    R = bb * T
    io = 2 * 2 * R * C * x_itemsize                    # double-buffered in + out blocks
    acts = 4 * (3 * R * C                              # fused qkv result
                + 10 * R * C                           # x/h1/acc/x2/h2/m + casts/temps
                + 2 * R * mlp_dim                      # mlp hidden + relu temp
                + 2 * bb * T * T)                      # scores + probs (one head live)
    return io + 2 * w_bytes + acts                     # weights also double-buffered


def _auto_batch_block(B, T, C, H, mlp_dim, x_itemsize, w_bytes,
                      vmem_budget=28 << 20, max_rows=2048):
    """Largest divisor of B giving >= 2 grid steps (pipelining + v7x dual-TC), rows per
    step <= max_rows, sublane-aligned blocks, and a footprint within the budget
    (28 MiB keeps headroom under v7x's 64 MiB physical VMEM)."""
    if B <= 1:
        return B
    for d in range(B, 0, -1):
        if B % d or B // d < 2:
            continue
        if (d * T) % 8:                    # (8, 128) sublane rule on the (R, C) block
            continue
        if d * T > max_rows:
            continue
        if _vmem_bytes_estimate(d, T, C, H, mlp_dim, x_itemsize, w_bytes) > vmem_budget:
            continue
        return d
    return B                               # fall back: single full-size step


def encoder_block(x, params, num_heads, dim_head, *,
                  batch_block=None, compute_dtype=jnp.float32):
    """x: (B, T, C) with C == num_heads * dim_head.  Returns (B, T, C)."""
    B, T, C = x.shape
    H, D = num_heads, dim_head
    assert C == H * D, "module assumes embed_dim == num_heads * dim_head"
    mlp_dim = params["w1"].shape[-1]

    f32 = jnp.float32
    cast = lambda w: w.astype(compute_dtype)           # bf16 weights at the boundary

    # Fused QKV weight (C, 3C); fold the dim_head^-0.5 query scale into the Q columns.
    wqkv = jnp.concatenate(
        [params["wq"].astype(f32) * (D ** -0.5),
         params["wk"].astype(f32),
         params["wv"].astype(f32)], axis=1)

    ln1_w = params["ln1_w"].astype(f32).reshape(1, C)
    ln2_w = params["ln2_w"].astype(f32).reshape(1, C)
    bo = params["bo"].astype(f32).reshape(1, C)
    b1 = params["b1"].astype(f32).reshape(1, mlp_dim)
    b2 = params["b2"].astype(f32).reshape(1, C)
    weights = (ln1_w, cast(wqkv), cast(params["wo"]), bo, ln2_w,
               cast(params["w1"]), b1, cast(params["w2"]), b2)
    w_bytes = sum(a.size * a.dtype.itemsize for a in weights)

    if batch_block is None:
        batch_block = _auto_batch_block(B, T, C, H, mlp_dim,
                                        x.dtype.itemsize, w_bytes)
    assert B % batch_block == 0
    nb = B // batch_block
    R = batch_block * T
    if nb > 1:
        assert R % 8 == 0, "batch_block * seq must be a multiple of 8 when nb > 1"

    # Explicit scoped-VMEM limit sized from the footprint (defaults are only 16/32 MiB
    # on v5e / v6e+v7x); capped comfortably under v7x's 64 MiB physical VMEM.
    est = _vmem_bytes_estimate(batch_block, T, C, H, mlp_dim, x.dtype.itemsize, w_bytes)
    vmem_limit = int(min(max(2 * est, 32 << 20), 60 << 20))

    # Present rows flattened: all dense layers see (Bb*T, C); wrapper reshape is free.
    x2d = x.reshape(B * T, C)
    kernel = _make_kernel(batch_block, T, H, D, compute_dtype)

    def rows_spec():
        return pl.BlockSpec((R, C), lambda i: (i, 0))

    # TODO(synk): for large C, single-buffer these constant-index weight blocks
    #             (pipeline_mode=pl.Buffered(1)) to halve their VMEM footprint.
    weight_specs = [pl.BlockSpec(a.shape, lambda i: (0, 0)) for a in weights]

    out2d = pl.pallas_call(
        kernel,
        out_shape=jax.ShapeDtypeStruct((B * T, C), x.dtype),
        grid=(nb,),
        in_specs=[rows_spec()] + weight_specs,
        out_specs=rows_spec(),
        compiler_params=pltpu.CompilerParams(
            # parallel batch-block axis: shards across v7x's 2 TensorCores, no-op on
            # single-TC v5e/v6e.
            dimension_semantics=("parallel",),
            vmem_limit_bytes=vmem_limit),
    )(x2d, *weights)

    return out2d.reshape(B, T, C)


def reference(x, p, H, D):
    """Pure-JAX fp32 reference mirroring the PyTorch forward (eval mode)."""
    def ln(v, w):
        mu = v.mean(-1, keepdims=True)
        var = ((v - mu) ** 2).mean(-1, keepdims=True)
        return (v - mu) / jnp.sqrt(var + EPS) * w.reshape(-1)

    B, T, C = x.shape
    h1 = ln(x, p["ln1_w"])
    q = (h1 @ p["wq"]).reshape(B, T, H, D).transpose(0, 2, 1, 3) * (D ** -0.5)
    k = (h1 @ p["wk"]).reshape(B, T, H, D).transpose(0, 2, 1, 3)
    v = (h1 @ p["wv"]).reshape(B, T, H, D).transpose(0, 2, 1, 3)
    s = jnp.einsum('bhid,bhjd->bhij', q, k)
    a = jax.nn.softmax(s, axis=-1)
    y = jnp.einsum('bhij,bhjd->bhid', a, v).transpose(0, 2, 1, 3).reshape(B, T, C)
    x2 = x + y @ p["wo"] + p["bo"].reshape(-1)
    h2 = ln(x2, p["ln2_w"])
    z = jax.nn.relu(h2 @ p["w1"] + p["b1"].reshape(-1))
    return x2 + h2 + z @ p["w2"] + p["b2"].reshape(-1)


if __name__ == "__main__":
    # Small shapes consistent with the module: embed_dim == num_heads * dim_head.
    B, T = 2, 8
    num_heads, dim_head = 4, 8
    embed_dim = num_heads * dim_head          # 32
    mlp_dim = 64
    # vocab_size / dropout are unused in this forward path (dropout -> eval identity).

    key = jax.random.PRNGKey(0)
    ks = jax.random.split(key, 10)
    f32 = jnp.float32

    params = {
        "ln1_w": jnp.ones((1, embed_dim), f32),               # LayerNorm inits to ones
        "ln2_w": jnp.ones((1, embed_dim), f32),
        "wq": 0.1 * jax.random.normal(ks[0], (embed_dim, embed_dim), f32),
        "wk": 0.1 * jax.random.normal(ks[1], (embed_dim, embed_dim), f32),
        "wv": 0.1 * jax.random.normal(ks[2], (embed_dim, embed_dim), f32),
        "wo": 0.1 * jax.random.normal(ks[3], (embed_dim, embed_dim), f32),
        "bo": 0.1 * jax.random.normal(ks[4], (1, embed_dim), f32),
        "w1": 0.1 * jax.random.normal(ks[5], (embed_dim, mlp_dim), f32),
        "b1": 0.1 * jax.random.normal(ks[6], (1, mlp_dim), f32),
        "w2": 0.1 * jax.random.normal(ks[7], (mlp_dim, embed_dim), f32),
        "b2": 0.1 * jax.random.normal(ks[8], (1, embed_dim), f32),
    }
    x = jax.random.normal(ks[9], (B, T, embed_dim), f32)

    ref = reference(x, params, num_heads, dim_head)

    # Exact-semantics path (fp32 matmuls) — tight check against the fp32 reference.
    out = encoder_block(x, params, num_heads, dim_head, compute_dtype=jnp.float32)
    out = jax.block_until_ready(out)
    assert out.shape == (B, T, embed_dim)
    assert jnp.allclose(out, ref, atol=1e-4, rtol=1e-4), "fp32 mismatch vs reference"

    # Performance path (bf16 MXU inputs, fp32 accumulation / LN / softmax).
    out_bf = encoder_block(x, params, num_heads, dim_head, compute_dtype=jnp.bfloat16)
    out_bf = jax.block_until_ready(out_bf)
    assert jnp.allclose(out_bf, ref, atol=5e-2, rtol=5e-2), "bf16 mismatch vs reference"

    print("KERNEL_OK")
</pallas_src>

<mosaic_0001>
module attributes {stable_mosaic.version = 11 : i64} {
  func.func @kernel(%arg0: i32, %arg1: memref<8x32xf32, #tpu.memory_space<vmem>>, %arg2: memref<1x32xf32, #tpu.memory_space<vmem>>, %arg3: memref<32x96xf32, #tpu.memory_space<vmem>>, %arg4: memref<32x32xf32, #tpu.memory_space<vmem>>, %arg5: memref<1x32xf32, #tpu.memory_space<vmem>>, %arg6: memref<1x32xf32, #tpu.memory_space<vmem>>, %arg7: memref<32x64xf32, #tpu.memory_space<vmem>>, %arg8: memref<1x64xf32, #tpu.memory_space<vmem>>, %arg9: memref<64x32xf32, #tpu.memory_space<vmem>>, %arg10: memref<1x32xf32, #tpu.memory_space<vmem>>, %arg11: memref<8x32xf32, #tpu.memory_space<vmem>>) attributes {dimension_semantics = [#tpu.dimension_semantics<parallel>], iteration_bounds = array<i64: 2>, scalar_prefetch = 0 : i64, scratch_operands = 0 : i64, tpu.core_type = #tpu.core_type<tc>, window_params = [{transform_indices = @transform_0, window_bounds = array<i64: 8, 32>}, {pipeline_mode = #tpu.pipeline_mode<synchronous>, transform_indices = @transform_1, window_bounds = array<i64: 1, 32>}, {pipeline_mode = #tpu.pipeline_mode<synchronous>, transform_indices = @transform_2, window_bounds = array<i64: 32, 96>}, {pipeline_mode = #tpu.pipeline_mode<synchronous>, transform_indices = @transform_3, window_bounds = array<i64: 32, 32>}, {pipeline_mode = #tpu.pipeline_mode<synchronous>, transform_indices = @transform_4, window_bounds = array<i64: 1, 32>}, {pipeline_mode = #tpu.pipeline_mode<synchronous>, transform_indices = @transform_5, window_bounds = array<i64: 1, 32>}, {pipeline_mode = #tpu.pipeline_mode<synchronous>, transform_indices = @transform_6, window_bounds = array<i64: 32, 64>}, {pipeline_mode = #tpu.pipeline_mode<synchronous>, transform_indices = @transform_7, window_bounds = array<i64: 1, 64>}, {pipeline_mode = #tpu.pipeline_mode<synchronous>, transform_indices = @transform_8, window_bounds = array<i64: 64, 32>}, {pipeline_mode = #tpu.pipeline_mode<synchronous>, transform_indices = @transform_9, window_bounds = array<i64: 1, 32>}, {transform_indices = @transform_10, window_bounds = array<i64: 8, 32>}]} {
    %c0 = arith.constant 0 : index
    %c0_0 = arith.constant 0 : index
    %0 = vector.load %arg1[%c0, %c0_0] : memref<8x32xf32, #tpu.memory_space<vmem>>, vector<8x32xf32>
    %c0_1 = arith.constant 0 : index
    %c0_2 = arith.constant 0 : index
    %1 = vector.load %arg2[%c0_1, %c0_2] : memref<1x32xf32, #tpu.memory_space<vmem>>, vector<1x32xf32>
    %cst = arith.constant dense<0.000000e+00> : vector<8xf32>
    %2 = vector.multi_reduction <add>, %0, %cst [1] : vector<8x32xf32> to vector<8xf32>
    %3 = vector.shape_cast %2 : vector<8xf32> to vector<8x1xf32>
    %cst_3 = arith.constant 3.200000e+01 : f32
    %4 = vector.broadcast %cst_3 : f32 to vector<8x1xf32>
    %5 = arith.divf %3, %4 : vector<8x1xf32>
    %6 = vector.broadcast %5 : vector<8x1xf32> to vector<8x32xf32>
    %7 = arith.subf %0, %6 : vector<8x32xf32>
    %8 = arith.mulf %7, %7 : vector<8x32xf32>
    %cst_4 = arith.constant dense<0.000000e+00> : vector<8xf32>
    %9 = vector.multi_reduction <add>, %8, %cst_4 [1] : vector<8x32xf32> to vector<8xf32>
    %10 = vector.shape_cast %9 : vector<8xf32> to vector<8x1xf32>
    %cst_5 = arith.constant 3.200000e+01 : f32
    %11 = vector.broadcast %cst_5 : f32 to vector<8x1xf32>
    %12 = arith.divf %10, %11 : vector<8x1xf32>
    %13 = vector.broadcast %5 : vector<8x1xf32> to vector<8x32xf32>
    %14 = arith.subf %0, %13 : vector<8x32xf32>
    %cst_6 = arith.constant 9.99999974E-6 : f32
    %15 = vector.broadcast %cst_6 : f32 to vector<8x1xf32>
    %16 = arith.addf %12, %15 : vector<8x1xf32>
    %17 = math.rsqrt %16 : vector<8x1xf32>
    %18 = vector.broadcast %17 : vector<8x1xf32> to vector<8x32xf32>
    %19 = arith.mulf %14, %18 : vector<8x32xf32>
    %20 = vector.broadcast %1 : vector<1x32xf32> to vector<8x32xf32>
    %21 = arith.mulf %19, %20 : vector<8x32xf32>
    %c0_7 = arith.constant 0 : index
    %c0_8 = arith.constant 0 : index
    %22 = vector.load %arg3[%c0_7, %c0_8] : memref<32x96xf32, #tpu.memory_space<vmem>>, vector<32x96xf32>
    %cst_9 = arith.constant dense<0.000000e+00> : vector<8x96xf32>
    %23 = tpu.matmul %21, %22, %cst_9 {dimension_numbers = #tpu.dot_dimension_numbers<[1], [0], [0], [1], [0, 0, 1, 1], [], []>} : vector<8x32xf32>, vector<32x96xf32>, vector<8x96xf32> -> vector<8x96xf32>
    %24 = vector.extract_strided_slice %23 {offsets = [0, 0], sizes = [8, 32], strides = [1, 1]} : vector<8x96xf32> to vector<8x32xf32>
    %25 = vector.shape_cast %24 : vector<8x32xf32> to vector<1x8x32xf32>
    %26 = vector.extract_strided_slice %23 {offsets = [0, 32], sizes = [8, 32], strides = [1, 1]} : vector<8x96xf32> to vector<8x32xf32>
    %27 = vector.shape_cast %26 : vector<8x32xf32> to vector<1x8x32xf32>
    %28 = vector.extract_strided_slice %23 {offsets = [0, 64], sizes = [8, 32], strides = [1, 1]} : vector<8x96xf32> to vector<8x32xf32>
    %29 = vector.shape_cast %28 : vector<8x32xf32> to vector<1x8x32xf32>
    %cst_10 = arith.constant 0.000000e+00 : f32
    %30 = vector.broadcast %cst_10 : f32 to vector<8x32xf32>
    %31 = vector.extract_strided_slice %25 {offsets = [0, 0, 0], sizes = [1, 8, 8], strides = [1, 1, 1]} : vector<1x8x32xf32> to vector<1x8x8xf32>
    %32 = vector.extract_strided_slice %27 {offsets = [0, 0, 0], sizes = [1, 8, 8], strides = [1, 1, 1]} : vector<1x8x32xf32> to vector<1x8x8xf32>
    %33 = vector.extract_strided_slice %29 {offsets = [0, 0, 0], sizes = [1, 8, 8], strides = [1, 1, 1]} : vector<1x8x32xf32> to vector<1x8x8xf32>
    "tpu.trace_start"() <{level = 10 : i32, message = "bid,bjd->bij"}> : () -> ()
    %cst_11 = arith.constant dense<0.000000e+00> : vector<1x8x8xf32>
    %34 = tpu.matmul %31, %32, %cst_11 {dimension_numbers = #tpu.dot_dimension_numbers<[2], [2], [1], [1], [0, 0, 0, 1, 1, 1], [0], [0]>} : vector<1x8x8xf32>, vector<1x8x8xf32>, vector<1x8x8xf32> -> vector<1x8x8xf32>
    "tpu.trace_stop"() : () -> ()
    %cst_12 = arith.constant dense<0xFF800000> : vector<1x8xf32>
    %35 = vector.multi_reduction <maximumf>, %34, %cst_12 [2] : vector<1x8x8xf32> to vector<1x8xf32>
    %36 = vector.shape_cast %35 : vector<1x8xf32> to vector<1x8x1xf32>
    %37 = vector.broadcast %36 : vector<1x8x1xf32> to vector<1x8x8xf32>
    %38 = arith.subf %34, %37 : vector<1x8x8xf32>
    %39 = math.exp %38 : vector<1x8x8xf32>
    %cst_13 = arith.constant dense<0.000000e+00> : vector<1x8xf32>
    %40 = vector.multi_reduction <add>, %39, %cst_13 [2] : vector<1x8x8xf32> to vector<1x8xf32>
    %41 = vector.shape_cast %40 : vector<1x8xf32> to vector<1x8x1xf32>
    %42 = tpu.reciprocal %41 : vector<1x8x1xf32> -> vector<1x8x1xf32>
    %43 = vector.broadcast %42 : vector<1x8x1xf32> to vector<1x8x8xf32>
    %44 = arith.mulf %39, %43 : vector<1x8x8xf32>
    "tpu.trace_start"() <{level = 10 : i32, message = "bij,bjd->bid"}> : () -> ()
    %cst_14 = arith.constant dense<0.000000e+00> : vector<1x8x8xf32>
    %45 = tpu.matmul %44, %33, %cst_14 {dimension_numbers = #tpu.dot_dimension_numbers<[2], [1], [1], [2], [0, 0, 0, 1, 1, 2], [0], [0]>} : vector<1x8x8xf32>, vector<1x8x8xf32>, vector<1x8x8xf32> -> vector<1x8x8xf32>
    "tpu.trace_stop"() : () -> ()
    %46 = vector.shape_cast %45 : vector<1x8x8xf32> to vector<8x8xf32>
    %c0_15 = arith.constant 0 : index
    %c0_16 = arith.constant 0 : index
    %47 = vector.load %arg4[%c0_15, %c0_16] : memref<32x32xf32, #tpu.memory_space<vmem>>, vector<8x32xf32>
    %cst_17 = arith.constant dense<0.000000e+00> : vector<8x32xf32>
    %48 = tpu.matmul %46, %47, %cst_17 {dimension_numbers = #tpu.dot_dimension_numbers<[1], [0], [0], [1], [0, 0, 1, 1], [], []>} : vector<8x8xf32>, vector<8x32xf32>, vector<8x32xf32> -> vector<8x32xf32>
    %49 = arith.addf %30, %48 : vector<8x32xf32>
    %50 = vector.extract_strided_slice %25 {offsets = [0, 0, 8], sizes = [1, 8, 8], strides = [1, 1, 1]} : vector<1x8x32xf32> to vector<1x8x8xf32>
    %51 = vector.extract_strided_slice %27 {offsets = [0, 0, 8], sizes = [1, 8, 8], strides = [1, 1, 1]} : vector<1x8x32xf32> to vector<1x8x8xf32>
    %52 = vector.extract_strided_slice %29 {offsets = [0, 0, 8], sizes = [1, 8, 8], strides = [1, 1, 1]} : vector<1x8x32xf32> to vector<1x8x8xf32>
    "tpu.trace_start"() <{level = 10 : i32, message = "bid,bjd->bij"}> : () -> ()
    %cst_18 = arith.constant dense<0.000000e+00> : vector<1x8x8xf32>
    %53 = tpu.matmul %50, %51, %cst_18 {dimension_numbers = #tpu.dot_dimension_numbers<[2], [2], [1], [1], [0, 0, 0, 1, 1, 1], [0], [0]>} : vector<1x8x8xf32>, vector<1x8x8xf32>, vector<1x8x8xf32> -> vector<1x8x8xf32>
    "tpu.trace_stop"() : () -> ()
    %cst_19 = arith.constant dense<0xFF800000> : vector<1x8xf32>
    %54 = vector.multi_reduction <maximumf>, %53, %cst_19 [2] : vector<1x8x8xf32> to vector<1x8xf32>
    %55 = vector.shape_cast %54 : vector<1x8xf32> to vector<1x8x1xf32>
    %56 = vector.broadcast %55 : vector<1x8x1xf32> to vector<1x8x8xf32>
    %57 = arith.subf %53, %56 : vector<1x8x8xf32>
    %58 = math.exp %57 : vector<1x8x8xf32>
    %cst_20 = arith.constant dense<0.000000e+00> : vector<1x8xf32>
    %59 = vector.multi_reduction <add>, %58, %cst_20 [2] : vector<1x8x8xf32> to vector<1x8xf32>
    %60 = vector.shape_cast %59 : vector<1x8xf32> to vector<1x8x1xf32>
    %61 = tpu.reciprocal %60 : vector<1x8x1xf32> -> vector<1x8x1xf32>
    %62 = vector.broadcast %61 : vector<1x8x1xf32> to vector<1x8x8xf32>
    %63 = arith.mulf %58, %62 : vector<1x8x8xf32>
    "tpu.trace_start"() <{level = 10 : i32, message = "bij,bjd->bid"}> : () -> ()
    %cst_21 = arith.constant dense<0.000000e+00> : vector<1x8x8xf32>
    %64 = tpu.matmul %63, %52, %cst_21 {dimension_numbers = #tpu.dot_dimension_numbers<[2], [1], [1], [2], [0, 0, 0, 1, 1, 2], [0], [0]>} : vector<1x8x8xf32>, vector<1x8x8xf32>, vector<1x8x8xf32> -> vector<1x8x8xf32>
    "tpu.trace_stop"() : () -> ()
    %65 = vector.shape_cast %64 : vector<1x8x8xf32> to vector<8x8xf32>
    %c8 = arith.constant 8 : index
    %c0_22 = arith.constant 0 : index
    %66 = vector.load %arg4[%c8, %c0_22] : memref<32x32xf32, #tpu.memory_space<vmem>>, vector<8x32xf32>
    %cst_23 = arith.constant dense<0.000000e+00> : vector<8x32xf32>
    %67 = tpu.matmul %65, %66, %cst_23 {dimension_numbers = #tpu.dot_dimension_numbers<[1], [0], [0], [1], [0, 0, 1, 1], [], []>} : vector<8x8xf32>, vector<8x32xf32>, vector<8x32xf32> -> vector<8x32xf32>
    %68 = arith.addf %49, %67 : vector<8x32xf32>
    %69 = vector.extract_strided_slice %25 {offsets = [0, 0, 16], sizes = [1, 8, 8], strides = [1, 1, 1]} : vector<1x8x32xf32> to vector<1x8x8xf32>
    %70 = vector.extract_strided_slice %27 {offsets = [0, 0, 16], sizes = [1, 8, 8], strides = [1, 1, 1]} : vector<1x8x32xf32> to vector<1x8x8xf32>
    %71 = vector.extract_strided_slice %29 {offsets = [0, 0, 16], sizes = [1, 8, 8], strides = [1, 1, 1]} : vector<1x8x32xf32> to vector<1x8x8xf32>
    "tpu.trace_start"() <{level = 10 : i32, message = "bid,bjd->bij"}> : () -> ()
    %cst_24 = arith.constant dense<0.000000e+00> : vector<1x8x8xf32>
    %72 = tpu.matmul %69, %70, %cst_24 {dimension_numbers = #tpu.dot_dimension_numbers<[2], [2], [1], [1], [0, 0, 0, 1, 1, 1], [0], [0]>} : vector<1x8x8xf32>, vector<1x8x8xf32>, vector<1x8x8xf32> -> vector<1x8x8xf32>
    "tpu.trace_stop"() : () -> ()
    %cst_25 = arith.constant dense<0xFF800000> : vector<1x8xf32>
    %73 = vector.multi_reduction <maximumf>, %72, %cst_25 [2] : vector<1x8x8xf32> to vector<1x8xf32>
    %74 = vector.shape_cast %73 : vector<1x8xf32> to vector<1x8x1xf32>
    %75 = vector.broadcast %74 : vector<1x8x1xf32> to vector<1x8x8xf32>
    %76 = arith.subf %72, %75 : vector<1x8x8xf32>
    %77 = math.exp %76 : vector<1x8x8xf32>
    %cst_26 = arith.constant dense<0.000000e+00> : vector<1x8xf32>
    %78 = vector.multi_reduction <add>, %77, %cst_26 [2] : vector<1x8x8xf32> to vector<1x8xf32>
    %79 = vector.shape_cast %78 : vector<1x8xf32> to vector<1x8x1xf32>
    %80 = tpu.reciprocal %79 : vector<1x8x1xf32> -> vector<1x8x1xf32>
    %81 = vector.broadcast %80 : vector<1x8x1xf32> to vector<1x8x8xf32>
    %82 = arith.mulf %77, %81 : vector<1x8x8xf32>
    "tpu.trace_start"() <{level = 10 : i32, message = "bij,bjd->bid"}> : () -> ()
    %cst_27 = arith.constant dense<0.000000e+00> : vector<1x8x8xf32>
    %83 = tpu.matmul %82, %71, %cst_27 {dimension_numbers = #tpu.dot_dimension_numbers<[2], [1], [1], [2], [0, 0, 0, 1, 1, 2], [0], [0]>} : vector<1x8x8xf32>, vector<1x8x8xf32>, vector<1x8x8xf32> -> vector<1x8x8xf32>
    "tpu.trace_stop"() : () -> ()
    %84 = vector.shape_cast %83 : vector<1x8x8xf32> to vector<8x8xf32>
    %c16 = arith.constant 16 : index
    %c0_28 = arith.constant 0 : index
    %85 = vector.load %arg4[%c16, %c0_28] : memref<32x32xf32, #tpu.memory_space<vmem>>, vector<8x32xf32>
    %cst_29 = arith.constant dense<0.000000e+00> : vector<8x32xf32>
    %86 = tpu.matmul %84, %85, %cst_29 {dimension_numbers = #tpu.dot_dimension_numbers<[1], [0], [0], [1], [0, 0, 1, 1], [], []>} : vector<8x8xf32>, vector<8x32xf32>, vector<8x32xf32> -> vector<8x32xf32>
    %87 = arith.addf %68, %86 : vector<8x32xf32>
    %88 = vector.extract_strided_slice %25 {offsets = [0, 0, 24], sizes = [1, 8, 8], strides = [1, 1, 1]} : vector<1x8x32xf32> to vector<1x8x8xf32>
    %89 = vector.extract_strided_slice %27 {offsets = [0, 0, 24], sizes = [1, 8, 8], strides = [1, 1, 1]} : vector<1x8x32xf32> to vector<1x8x8xf32>
    %90 = vector.extract_strided_slice %29 {offsets = [0, 0, 24], sizes = [1, 8, 8], strides = [1, 1, 1]} : vector<1x8x32xf32> to vector<1x8x8xf32>
    "tpu.trace_start"() <{level = 10 : i32, message = "bid,bjd->bij"}> : () -> ()
    %cst_30 = arith.constant dense<0.000000e+00> : vector<1x8x8xf32>
    %91 = tpu.matmul %88, %89, %cst_30 {dimension_numbers = #tpu.dot_dimension_numbers<[2], [2], [1], [1], [0, 0, 0, 1, 1, 1], [0], [0]>} : vector<1x8x8xf32>, vector<1x8x8xf32>, vector<1x8x8xf32> -> vector<1x8x8xf32>
    "tpu.trace_stop"() : () -> ()
    %cst_31 = arith.constant dense<0xFF800000> : vector<1x8xf32>
    %92 = vector.multi_reduction <maximumf>, %91, %cst_31 [2] : vector<1x8x8xf32> to vector<1x8xf32>
    %93 = vector.shape_cast %92 : vector<1x8xf32> to vector<1x8x1xf32>
    %94 = vector.broadcast %93 : vector<1x8x1xf32> to vector<1x8x8xf32>
    %95 = arith.subf %91, %94 : vector<1x8x8xf32>
    %96 = math.exp %95 : vector<1x8x8xf32>
    %cst_32 = arith.constant dense<0.000000e+00> : vector<1x8xf32>
    %97 = vector.multi_reduction <add>, %96, %cst_32 [2] : vector<1x8x8xf32> to vector<1x8xf32>
    %98 = vector.shape_cast %97 : vector<1x8xf32> to vector<1x8x1xf32>
    %99 = tpu.reciprocal %98 : vector<1x8x1xf32> -> vector<1x8x1xf32>
    %100 = vector.broadcast %99 : vector<1x8x1xf32> to vector<1x8x8xf32>
    %101 = arith.mulf %96, %100 : vector<1x8x8xf32>
    "tpu.trace_start"() <{level = 10 : i32, message = "bij,bjd->bid"}> : () -> ()
    %cst_33 = arith.constant dense<0.000000e+00> : vector<1x8x8xf32>
    %102 = tpu.matmul %101, %90, %cst_33 {dimension_numbers = #tpu.dot_dimension_numbers<[2], [1], [1], [2], [0, 0, 0, 1, 1, 2], [0], [0]>} : vector<1x8x8xf32>, vector<1x8x8xf32>, vector<1x8x8xf32> -> vector<1x8x8xf32>
    "tpu.trace_stop"() : () -> ()
    %103 = vector.shape_cast %102 : vector<1x8x8xf32> to vector<8x8xf32>
    %c24 = arith.constant 24 : index
    %c0_34 = arith.constant 0 : index
    %104 = vector.load %arg4[%c24, %c0_34] : memref<32x32xf32, #tpu.memory_space<vmem>>, vector<8x32xf32>
    %cst_35 = arith.constant dense<0.000000e+00> : vector<8x32xf32>
    %105 = tpu.matmul %103, %104, %cst_35 {dimension_numbers = #tpu.dot_dimension_numbers<[1], [0], [0], [1], [0, 0, 1, 1], [], []>} : vector<8x8xf32>, vector<8x32xf32>, vector<8x32xf32> -> vector<8x32xf32>
    %106 = arith.addf %87, %105 : vector<8x32xf32>
    %107 = arith.addf %0, %106 : vector<8x32xf32>
    %c0_36 = arith.constant 0 : index
    %c0_37 = arith.constant 0 : index
    %108 = vector.load %arg5[%c0_36, %c0_37] : memref<1x32xf32, #tpu.memory_space<vmem>>, vector<1x32xf32>
    %109 = vector.broadcast %108 : vector<1x32xf32> to vector<8x32xf32>
    %110 = arith.addf %107, %109 : vector<8x32xf32>
    %c0_38 = arith.constant 0 : index
    %c0_39 = arith.constant 0 : index
    %111 = vector.load %arg6[%c0_38, %c0_39] : memref<1x32xf32, #tpu.memory_space<vmem>>, vector<1x32xf32>
    %cst_40 = arith.constant dense<0.000000e+00> : vector<8xf32>
    %112 = vector.multi_reduction <add>, %110, %cst_40 [1] : vector<8x32xf32> to vector<8xf32>
    %113 = vector.shape_cast %112 : vector<8xf32> to vector<8x1xf32>
    %cst_41 = arith.constant 3.200000e+01 : f32
    %114 = vector.broadcast %cst_41 : f32 to vector<8x1xf32>
    %115 = arith.divf %113, %114 : vector<8x1xf32>
    %116 = vector.broadcast %115 : vector<8x1xf32> to vector<8x32xf32>
    %117 = arith.subf %110, %116 : vector<8x32xf32>
    %118 = arith.mulf %117, %117 : vector<8x32xf32>
    %cst_42 = arith.constant dense<0.000000e+00> : vector<8xf32>
    %119 = vector.multi_reduction <add>, %118, %cst_42 [1] : vector<8x32xf32> to vector<8xf32>
    %120 = vector.shape_cast %119 : vector<8xf32> to vector<8x1xf32>
    %cst_43 = arith.constant 3.200000e+01 : f32
    %121 = vector.broadcast %cst_43 : f32 to vector<8x1xf32>
    %122 = arith.divf %120, %121 : vector<8x1xf32>
    %123 = vector.broadcast %115 : vector<8x1xf32> to vector<8x32xf32>
    %124 = arith.subf %110, %123 : vector<8x32xf32>
    %cst_44 = arith.constant 9.99999974E-6 : f32
    %125 = vector.broadcast %cst_44 : f32 to vector<8x1xf32>
    %126 = arith.addf %122, %125 : vector<8x1xf32>
    %127 = math.rsqrt %126 : vector<8x1xf32>
    %128 = vector.broadcast %127 : vector<8x1xf32> to vector<8x32xf32>
    %129 = arith.mulf %124, %128 : vector<8x32xf32>
    %130 = vector.broadcast %111 : vector<1x32xf32> to vector<8x32xf32>
    %131 = arith.mulf %129, %130 : vector<8x32xf32>
    %c0_45 = arith.constant 0 : index
    %c0_46 = arith.constant 0 : index
    %132 = vector.load %arg7[%c0_45, %c0_46] : memref<32x64xf32, #tpu.memory_space<vmem>>, vector<32x64xf32>
    %cst_47 = arith.constant dense<0.000000e+00> : vector<8x64xf32>
    %133 = tpu.matmul %131, %132, %cst_47 {dimension_numbers = #tpu.dot_dimension_numbers<[1], [0], [0], [1], [0, 0, 1, 1], [], []>} : vector<8x32xf32>, vector<32x64xf32>, vector<8x64xf32> -> vector<8x64xf32>
    %c0_48 = arith.constant 0 : index
    %c0_49 = arith.constant 0 : index
    %134 = vector.load %arg8[%c0_48, %c0_49] : memref<1x64xf32, #tpu.memory_space<vmem>>, vector<1x64xf32>
    %135 = vector.broadcast %134 : vector<1x64xf32> to vector<8x64xf32>
    %136 = arith.addf %133, %135 : vector<8x64xf32>
    %cst_50 = arith.constant 0.000000e+00 : f32
    %137 = vector.broadcast %cst_50 : f32 to vector<8x64xf32>
    %138 = arith.maximumf %136, %137 : vector<8x64xf32>
    %c0_51 = arith.constant 0 : index
    %c0_52 = arith.constant 0 : index
    %139 = vector.load %arg9[%c0_51, %c0_52] : memref<64x32xf32, #tpu.memory_space<vmem>>, vector<64x32xf32>
    %cst_53 = arith.constant dense<0.000000e+00> : vector<8x32xf32>
    %140 = tpu.matmul %138, %139, %cst_53 {dimension_numbers = #tpu.dot_dimension_numbers<[1], [0], [0], [1], [0, 0, 1, 1], [], []>} : vector<8x64xf32>, vector<64x32xf32>, vector<8x32xf32> -> vector<8x32xf32>
    %c0_54 = arith.constant 0 : index
    %c0_55 = arith.constant 0 : index
    %141 = vector.load %arg10[%c0_54, %c0_55] : memref<1x32xf32, #tpu.memory_space<vmem>>, vector<1x32xf32>
    %142 = vector.broadcast %141 : vector<1x32xf32> to vector<8x32xf32>
    %143 = arith.addf %140, %142 : vector<8x32xf32>
    %144 = arith.addf %110, %131 : vector<8x32xf32>
    %145 = arith.addf %144, %143 : vector<8x32xf32>
    %c0_56 = arith.constant 0 : index
    %c0_57 = arith.constant 0 : index
    %146 = vector.load %arg11[%c0_56, %c0_57] : memref<8x32xf32, #tpu.memory_space<vmem>>, vector<8x32xf32>
    tpu.vector_store %arg11[%c0_56, %c0_57], %145 {strides = array<i32>} : memref<8x32xf32, #tpu.memory_space<vmem>>, vector<8x32xf32>,
    return
  }
  func.func @transform_0(%arg0: i32) -> (i32, i32) {
    %c0_i32 = arith.constant 0 : i32
    %c0_i32_0 = arith.constant 0 : i32
    return %arg0, %c0_i32 : i32, i32
  }
  func.func @transform_1(%arg0: i32) -> (i32, i32) {
    %c0_i32 = arith.constant 0 : i32
    %c0_i32_0 = arith.constant 0 : i32
    %c0_i32_1 = arith.constant 0 : i32
    return %c0_i32, %c0_i32_0 : i32, i32
  }
  func.func @transform_2(%arg0: i32) -> (i32, i32) {
    %c0_i32 = arith.constant 0 : i32
    %c0_i32_0 = arith.constant 0 : i32
    %c0_i32_1 = arith.constant 0 : i32
    return %c0_i32, %c0_i32_0 : i32, i32
  }
  func.func @transform_3(%arg0: i32) -> (i32, i32) {
    %c0_i32 = arith.constant 0 : i32
    %c0_i32_0 = arith.constant 0 : i32
    %c0_i32_1 = arith.constant 0 : i32
    return %c0_i32, %c0_i32_0 : i32, i32
  }
  func.func @transform_4(%arg0: i32) -> (i32, i32) {
    %c0_i32 = arith.constant 0 : i32
    %c0_i32_0 = arith.constant 0 : i32
    %c0_i32_1 = arith.constant 0 : i32
    return %c0_i32, %c0_i32_0 : i32, i32
  }
  func.func @transform_5(%arg0: i32) -> (i32, i32) {
    %c0_i32 = arith.constant 0 : i32
    %c0_i32_0 = arith.constant 0 : i32
    %c0_i32_1 = arith.constant 0 : i32
    return %c0_i32, %c0_i32_0 : i32, i32
  }
  func.func @transform_6(%arg0: i32) -> (i32, i32) {
    %c0_i32 = arith.constant 0 : i32
    %c0_i32_0 = arith.constant 0 : i32
    %c0_i32_1 = arith.constant 0 : i32
    return %c0_i32, %c0_i32_0 : i32, i32
  }
  func.func @transform_7(%arg0: i32) -> (i32, i32) {
    %c0_i32 = arith.constant 0 : i32
    %c0_i32_0 = arith.constant 0 : i32
    %c0_i32_1 = arith.constant 0 : i32
    return %c0_i32, %c0_i32_0 : i32, i32
  }
  func.func @transform_8(%arg0: i32) -> (i32, i32) {
    %c0_i32 = arith.constant 0 : i32
    %c0_i32_0 = arith.constant 0 : i32
    %c0_i32_1 = arith.constant 0 : i32
    return %c0_i32, %c0_i32_0 : i32, i32
  }
  func.func @transform_9(%arg0: i32) -> (i32, i32) {
    %c0_i32 = arith.constant 0 : i32
    %c0_i32_0 = arith.constant 0 : i32
    %c0_i32_1 = arith.constant 0 : i32
    return %c0_i32, %c0_i32_0 : i32, i32
  }
  func.func @transform_10(%arg0: i32) -> (i32, i32) {
    %c0_i32 = arith.constant 0 : i32
    %c0_i32_0 = arith.constant 0 : i32
    return %arg0, %c0_i32 : i32, i32
  }
}

</mosaic_0001>

<bundles_post_ra>
// kernel: tpu_custom_call.1
= control target key start
LH: loop header
LB: loop body
LE: loop exit
PB: predicated region body
PF: predicated region fallthrough
CT: control target
= control target key end

     0   :  { %15 = vsyncpa [#allocation3], 0  ;;  %s2481_s0 = inlined_call_operand.hbm [shape: f32[16,32], index: 0, kind: input, shape index: {}]   ;;  %s2482_s1 = inlined_call_operand.vmem [shape: f32[1,32], index: 1, kind: input, shape index: {}]   ;;  %s2483_s2 = inlined_call_operand.vmem [shape: f32[32,96], index: 2, kind: input, shape index: {}]   ;;  %s2484_s3 = inlined_call_operand.vmem [shape: f32[32,32], index: 3, kind: input, shape index: {}]   ;;  %s2485_s4 = inlined_call_operand.vmem [shape: f32[1,32], index: 4, kind: input, shape index: {}]   ;;  %s2486_s5 = inlined_call_operand.vmem [shape: f32[1,32], index: 5, kind: input, shape index: {}]   ;;  %s2487_s6 = inlined_call_operand.vmem [shape: f32[32,64], index: 6, kind: input, shape index: {}]   ;;  %s2488_s7 = inlined_call_operand.vmem [shape: f32[1,64], index: 7, kind: input, shape index: {}]   ;;  %s2489_s8 = inlined_call_operand.vmem [shape: f32[64,32], index: 8, kind: input, shape index: {}]   ;;  %s2490_s9 = inlined_call_operand.vmem [shape: f32[1,32], index: 9, kind: input, shape index: {}]   ;;  %s2491_s10 = inlined_call_operand.hbm [shape: f32[16,32], index: 10, kind: output, shape index: {}]  }
   0x1   :  { %17 = vsyncpa [#allocation3 + $0x1], 0 }
   0x2   :  { %18 = vsyncpa [#allocation4], 0 }
   0x3   :  { %20 = vsyncpa [#allocation4 + $0x1], 0  ;;  %s2148_s13 = smov 0   ;;  %s2150_s14 = smov 0  }
   0x4   :  { %s2152_s15 = smov 0   ;;  %s2154_s16 = smov 0  }
   0x5 LB: > { %2497 = sst [smem:[#allocation8_spill]] %s2072_s15  ;;  %s2169_s17 = sadd.s32 4294967295, %s2076_s16   ;;  %s2076_s16 = sphi %s2154_s16, %s2511_s16   ;;  %s2072_s15 = sphi %s2152_s15, %s2513_s15   ;;  %s2068_s14 = sphi %s2150_s14, %s2515_s14   ;;  %s2064_s13 = sphi %s2148_s13, %s2514_s13  }
   0x6   : > { %s1725_s18 = sadd.s32 4294967294, %s2076_s16   ;;  %s2173_s19 = sadd.s32 1, %s2076_s16  }
   0x7   : > { %2498 = sst [smem:[#allocation9_spill]] %s2173_s19  ;;  %s33_s20 = sadd.s32 1, %s2072_s15 }
   0x8   : > { %s30_s21 = ssub.s32 %s2076_s16, %s2173_s19  ;;  %p40_p0 = scmp.ne.s32.totalorder %s2072_s15, %s2068_s14 }
   0x9   : > { %p31_p1 = scmp.eq.s32.totalorder %s30_s21, 0  ;;  %p41_p2 = scmp.eq.s32.totalorder %s2076_s16, 0 }
   0xa   : > { %p46_p3 = scmp.ne.s32.totalorder %s2068_s14, %s2064_s13  ;;  %p47_p4 = scmp.eq.s32.totalorder %s2169_s17, 0 }
   0xb   : > { %s2185_s22 = scalar_select %p31_p1, %s2072_s15, %s33_s20  }
   0xc   : > { %p2187_p5 = por %p41_p2, %p40_p0  ;;  %p2191_p6 = por %p47_p4, %p46_p3 }
   0xd   : > { %2499 = sst [smem:[#allocation10_spill]] %s2185_s22  ;;  %p259_p7 = scmp.eq.s32.totalorder %s2169_s17, 1 }
   0xe   : > { %s2501_s24 = scalar_select %p2191_p6, 1, 0 }
   0xf   : > { %p265_p8 = scmp.eq.s32.totalorder %s1725_s18, 1  ;;  %p1917_p10 = scmp.lt.s32.totalorder %s2076_s16, 2 }
  0x10   : > { %p2198_p11 = por %p259_p7, %p40_p0  ;;  %s312_s27 = sand.u32 1, %s2072_s15  }
  0x11   : > { %p2202_p12 = por %p265_p8, %p46_p3  ;;  %s1729_s28 = sshll.u32 %s2076_s16, 7 }
  0x12   : > { %s2502_s25 = scalar_select %p2198_p11, 1, 0 }
  0x13   : > { %s2503_s26 = scalar_select %p2202_p12, 1, 0 }
  0x14   : > { %s1728_s29 = sshll.u32 %s312_s27, 3  ;;  %s2211_s12 = scalar_lea.hbm %s2481_s0, %s1729_s28 }
  0x15   : > { %s316_s18 = scalar_lea.vmem [#allocation2], %s1728_s29  ;;  %p2215_p13 = pnand %p1917_p10, %p2187_p5 }
  0x16   : > { %s323_s20 = sshll.u32 %s316_s18, 4  ;;  %s313_s22 = scalar_lea.sflag [#allocation3], %s312_s27  ;;  %s2219_s20 = int_to_ptr.vmem [resolvable:$true] %s323_s20 }
  0x17   : > { %s1984_s15 = scalar_lea.hbm %s2211_s12, 128  ;;  %p1986_p3 = pneg %p2215_p13 }
  0x18   : > { %p1985_p2 = scmp.ne.s32.totalorder %s2211_s12, %s1984_s15  ;;  %s1989_s23 = scalar_lea.hbm %s2481_s0, 256 }
  0x19   : > { %p1990_p5 = scmp.lt.s32.totalorder %s2211_s12, %s2481_s0  ;;  %p1991_p8 = scmp.lt.s32.totalorder %s1989_s23, %s1984_s15 }
  0x1a   : > { %p1987_p4 = pnand %p1986_p3, %p1985_p2 }
  0x1b   : > { %p1992_p10 = por %p1991_p8, %p1990_p5 }
  0x1c   : > { %p1988_p7 = pneg %p1987_p4 }
  0x1e   : > { %p1993_p9 = pnand %p1992_p10, %p1988_p7 }
  0x20   : > { %1996 = shalt.err (!%p1993_p9)
}
  0x21   : > { %s1997_s27 = scalar_lea.vmem %s2219_s20, 128  ;;  %s2078_s18 = smov [#allocation2]  }
  0x22   : > { %p1998_p0 = scmp.ne.s32.totalorder %s2219_s20, %s1997_s27  ;;  %s2002_s19 = sshll.u32 %s2078_s18, 4  ;;  %s2003_s19 = int_to_ptr.vmem [resolvable:$false] %s2002_s19 }
  0x23   : > { %s2004_s28 = scalar_lea.vmem %s2003_s19, 256  ;;  %p2005_p4 = scmp.lt.s32.totalorder %s2219_s20, %s2003_s19 }
  0x24   : > { %p2000_p1 = pnand %p1998_p0, %p1986_p3  ;;  %p2006_p12 = scmp.lt.s32.totalorder %s2004_s28, %s1997_s27 }
  0x26   : > { %p2001_p2 = pneg %p2000_p1  ;;  %p2007_p11 = por %p2006_p12, %p2005_p4 }
  0x28   : > { %p2008_p6 = pnand %p2007_p11, %p2001_p2 }
  0x2a   : > { %2011 = shalt.err (!%p2008_p6)
}
  0x2b   : > { %1912 = dma.hbm_to_vmem [thread:$0]  (!%p2215_p13), %s2211_s12, 128, %s2219_s20, %s313_s22  }
  0x2c   : > { %p2505_p9 = scmp.lt.s32.totalorder %s2076_s16, 3  ;;  %p2506_p7 = scmp.ge.s32.totalorder %s2076_s16, 1 }
  0x2e   : > { %p329_p0 = pnand %p2506_p7, %p2505_p9 }
  0x2f   : > { %s2246_s15 = sand.u32 (!%p329_p0), 1, %s2068_s14   ;;  %p2507_p6 = scmp.ne.s32.totalorder (!%p329_p0), %s2501_s24, 0 }
  0x30   : > { %332 = sbr.rel (%p329_p0) target bundleno = 3497 (0xda9), region = 60  ;;  %s1731_s19 = sshll.u32 (!%p329_p0), %s2246_s15, 3 }
  0x31   : > { %s335_s29 = scalar_lea.sflag (!%p329_p0), [#allocation3], %s2246_s15  ;;  %s338_s21 = scalar_lea.vmem (!%p329_p0), [#allocation2], %s1731_s19 }
  0x35   : > { %2055 = dma.done.wait (%p2507_p6), %s335_s29, 128  }
  0x36   : > { %2057 = vsyncadd (%p2507_p6), %s335_s29, 4294967168  ;;  %vm377_vm0 = vcmask 261120   ;;  %v2256_v0 = vld [vmem:[%s338_s21] sm:$0xff]  ;;  %v402_v7 = vld [vmem:[%s2483_s2 + $0x18] sm:$0xff]  ;;  %v2079_v8 = vmov 0.0   ;;  %vm2080_vm1 = vmmov 0  }
  0x37   : > { %v378_v1 = vsel %vm377_vm0, %v2256_v0, 0.0  ;;  %1804 = vmatprep.subr.mxu0 %v2079_v8  ;;  %v401_v9 = vld [vmem:[%s2483_s2 + $0x10] sm:$0xff]  ;;  %1812 = vmatprep.mubr.msk.f32.mxu0 %vm2080_vm1, %v2079_v8  ;;  %v400_v10 = vld [vmem:[%s2483_s2 + $0x8] sm:$0xff]  ;;  %v399_v11 = vld [vmem:[%s2483_s2] sm:$0xff]  ;;  %s2081_s29 = smov 120   ;;  %s2082_s21 = smov 96  }
  0x38   : > { %379 = vadd.xlane.f32.xlu0 %v378_v1  ;;  %1805 = vmatpush3.msra.mxu0 %v402_v7  ;;  %v1733_v16 = vld [vmem:[%s2482_s1] ss:$0 sm:$0xff]  ;;  %s2083_s22 = smov 88   ;;  %vm479_vm2 = vcmask 64512   ;;  %s2084_s12 = smov 56   ;;  %v807_v49 = vld [vmem:[%s2484_s3 + $0x8] sm:$0xff] }
  0x39   : > { %1820 = vmatprep.subr.mxu1 %v2079_v8  ;;  %1806 = vmatprep.subr.mxu0 %v2079_v8  ;;  %s2085_s24 = smov 64   ;;  %s2086_s20 = smov 80   ;;  %v641_v48 = vld [vmem:[%s2484_s3] sm:$0xff]  ;;  %vm1564_vm3 = vcmask 523264  }
  0x3a   : > { %1822 = vmatprep.mubr.msk.f32.mxu1 %vm2080_vm1, %v2079_v8  ;;  %1807 = vmatpush3.msra.mxu0 %v401_v9  ;;  %s2087_s23 = smov 112   ;;  %s2088_s28 = smov 48  }
  0x3b   : > { %1808 = vmatprep.subr.mxu0 %v2079_v8  ;;  %s1642_s27 = scalar_lea.sflag [#allocation4], %s2246_s15  ;;  %p2508_p12 = scmp.ne.s32.totalorder %s2502_s25, 0 }
  0x3c   : > { %1809 = vmatpush3.msra.mxu0 %v400_v10 }
  0x3d   : > { %1810 = vmatprep.subr.mxu0 %v2079_v8 }
  0x3e   : > { %1811 = vmatpush3.msra.mxu0 %v399_v11 }
  0x3f   : > { %1815 = vmatprep.subr.mxu0 %v2079_v8 }
  0xc1   : > { %v380_v2 = vpop.xlane.xlu0 %379 }
  0xc2   : > { %v382_v3 = vmul.f32 0.03125, %v380_v2 }
  0xc4   : > { %v383_v4 = vsub.f32 %v2256_v0, %v382_v3 }
  0xc6   : > { %v384_v5 = vmul.f32 %v383_v4, %v383_v4 }
  0xc8   : > { %v385_v6 = vsel %vm377_vm0, %v384_v5, 0.0 }
  0xc9   : > { %386 = vadd.xlane.f32.xlu0 %v385_v6 }
 0x152   : > { %v387_v12 = vpop.xlane.xlu0 %386 }
 0x153   : > { %v388_v13 = vmul.f32 0.03125, %v387_v12 }
 0x155   : > { %v389_v14 = vadd.f32 1e-05, %v388_v13  ;;  %v1119_v13 = vld [vmem:[%s2484_s3 + $0x10] sm:$0xff] }
 0x157   : > { %1964 = vrsqrt.f32 %v389_v14 }
 0x164   : > { %v1965_v15 = vpop.eup %1964 }
 0x165   : > { %v391_v17 = vmul.f32 %v1965_v15, %v383_v4 }
 0x167   : > { %v398_v18 = vmul.f32 %v1733_v16, %v391_v17 }
 0x169   : > { %1813 = vmatmul.mubr.msk.f32.vlgmr.msra.gmra.mxu0 %vm377_vm0, %v398_v18 }
 0x16a   : > { %1817 = vmatprep.mubr.msk.f32.mxu0 %vm2080_vm1, %v2079_v8 }
 0x229   : > { %v2290_v19 = vpop.f32.mrf.mxu0 }
 0x22a   : > { %642 = vrot.lane.b32.xlu0 %v2290_v19, %s2081_s29  ;;  %477 = vrot.lane.b32.xlu1 %v2290_v19, %s2082_s21  ;;  %s2089_s29 = smov 104   ;;  %s2090_s21 = smov 72  }
 0x22b   : > { %v1814_v20 = vpop.f32.mrf.mxu0 }
 0x22e   : > { %644 = vrot.lane.b32.xlu1 %v2290_v19, %s2083_s22 }
 0x29c   : > { %v478_v21 = vpop.permute.xlu1 %477  ;;  %v643_v23 = vpop.permute.xlu0 %642 }
 0x29d   : > { %1816 = vmatpush3.xpose.msk.msra.mxu0 %vm479_vm2, %v478_v21 }
 0x29e   : > { %1825 = vmatprep.subr.mxu0 %v2079_v8 }
 0x2a0   : > { %1818 = vmatmul.mubr.msk.f32.vlgmr.msra.gmra.mxu0 %vm479_vm2, %v2290_v19  ;;  %v645_v22 = vpop.permute.xlu1 %644 }
 0x2a1   : > { %1826 = vmatpush3.xpose.msk.msra.mxu0 %vm479_vm2, %v645_v22  ;;  %1827 = vmatprep.mubr.msk.f32.mxu0 %vm2080_vm1, %v2079_v8 }
 0x2a2   : > { %1835 = vmatprep.subr.mxu0 %v2079_v8 }
 0x2a4   : > { %1828 = vmatmul.mubr.msk.f32.vlgmr.msra.gmra.mxu0 %vm479_vm2, %v643_v23 }
 0x2a5   : > { %1837 = vmatprep.mubr.msk.f32.mxu0 %vm2080_vm1, %v2079_v8  ;;  %1836 = vmatpush3.msra.mxu0 %v807_v49  ;;  %v1556_v49 = vld [vmem:[%s2489_s8 + $0x38] sm:$0xff] }
 0x2a6   : > { %1845 = vmatprep.subr.mxu0 %v2079_v8 }
 0x360   : > { %v550_v24 = vpop.f32.mrf.mxu0 }
 0x361   : > { %v554_v25 = vsel %vm479_vm2, %v550_v24, -inf }
 0x362   : > { %555 = vmax.xlane.f32.xlu1 %v554_v25  ;;  %v1819_v26 = vpop.f32.mrf.mxu0  ;;  %v1359_v25 = vld [vmem:[%s2484_s3 + $0x18] sm:$0xff] }
 0x364   : > { %v716_v27 = vpop.f32.mrf.mxu0 }
 0x365   : > { %v720_v28 = vsel %vm479_vm2, %v716_v27, -inf }
 0x366   : > { %721 = vmax.xlane.f32.xlu0 %v720_v28  ;;  %v1829_v29 = vpop.f32.mrf.mxu0 }
 0x37c   : > { %731 = vrot.lane.b32.xlu0 %v2290_v19, %s2084_s12  ;;  %s1758_s12 = sshll.u32 %s2169_s17, 7  ;;  %s2092_s17 = smov [#allocation5]  }
 0x37d   : > { %s1653_s11 = scalar_lea.hbm %s2491_s10, %s1758_s12 }
 0x3eb   : > { %v556_v30 = vpop.xlane.xlu1 %555 }
 0x3ec   : > { %v557_v31 = vsub.f32 %v550_v24, %v556_v30 }
 0x3ee   : > { %v558_v32 = vmul.f32 1.442695, %v557_v31 }
 0x3ef   : > { %v722_v33 = vpop.xlane.xlu0 %721 }
 0x3f0   : > { %1966 = vpow2.f32 %v558_v32  ;;  %v723_v34 = vsub.f32 %v716_v27, %v722_v33 }
 0x3f2   : > { %v724_v35 = vmul.f32 1.442695, %v723_v34 }
 0x3f3   : > { %v732_v45 = vpop.permute.xlu0 %731 }
 0x3f4   : > { %1968 = vpow2.f32 %v724_v35 }
 0x3fd   : > { %v1967_v36 = vpop.eup %1966 }
 0x3fe   : > { %v560_v37 = vsel %vm479_vm2, %v1967_v36, 0.0 }
 0x3ff   : > { %561 = vadd.xlane.f32.xlu1 %v560_v37 }
 0x401   : > { %v1969_v38 = vpop.eup %1968 }
 0x402   : > { %v726_v39 = vsel %vm479_vm2, %v1969_v38, 0.0 }
 0x403   : > { %727 = vadd.xlane.f32.xlu1 %v726_v39 }
 0x414   : > { %565 = vrot.lane.b32.xlu1 %v2290_v19, %s2085_s24  ;;  %s2091_s24 = smov 40  }
 0x418   : > { %956 = vrot.lane.b32.xlu1 %v2290_v19, %s2086_s20 }
 0x41c   : > { %954 = vrot.lane.b32.xlu1 %v2290_v19, %s2087_s23 }
 0x488   : > { %v562_v40 = vpop.xlane.xlu1 %561 }
 0x489   : > { %1970 = vrcp.f32 %v562_v40 }
 0x48c   : > { %v728_v41 = vpop.xlane.xlu1 %727 }
 0x48d   : > { %1972 = vrcp.f32 %v728_v41 }
 0x490   : > { %v566_v42 = vpop.permute.xlu1 %565 }
 0x491   : > { %1821 = vmatpush3.msra.mxu1 %v566_v42 }
 0x492   : > { %1830 = vmatprep.subr.mxu1 %v2079_v8 }
 0x494   : > { %v957_v51 = vpop.permute.xlu1 %956 }
 0x496   : > { %v1971_v43 = vpop.eup %1970 }
 0x497   : > { %v564_v44 = vmul.f32 %v1971_v43, %v1967_v36  ;;  %v1751_v36 = vld [vmem:[%s2485_s4] ss:$0 sm:$0xff] }
 0x498   : > { %v955_v55 = vpop.permute.xlu1 %954 }
 0x499   : > { %1823 = vmatmul.mubr.msk.f32.vlgmr.msra.gmra.mxu1 %vm479_vm2, %v564_v44 }
 0x49a   : > { %v1973_v46 = vpop.eup %1972  ;;  %1831 = vmatpush3.msra.mxu1 %v732_v45  ;;  %1832 = vmatprep.mubr.msk.f32.mxu1 %vm2080_vm1, %v2079_v8 }
 0x49b   : > { %v730_v47 = vmul.f32 %v1973_v46, %v1969_v38  ;;  %1840 = vmatprep.subr.mxu1 %v2079_v8  ;;  %v1467_v46 = vld [vmem:[%s2487_s6 + $0x18] sm:$0xff] }
 0x49d   : > { %1833 = vmatmul.mubr.msk.f32.vlgmr.msra.gmra.mxu1 %vm479_vm2, %v730_v47  ;;  %v1465_v47 = vld [vmem:[%s2487_s6 + $0x8] sm:$0xff] }
 0x49e   : > { %1842 = vmatprep.mubr.msk.f32.mxu1 %vm2080_vm1, %v2079_v8  ;;  %1841 = vmatpush3.msra.mxu1 %v641_v48  ;;  %v1464_v48 = vld [vmem:[%s2487_s6] sm:$0xff] }
 0x49f   : > { %1850 = vmatprep.subr.mxu1 %v2079_v8 }
 0x559   : > { %v637_v50 = vpop.f32.mrf.mxu1 }
 0x55a   : > { %1843 = vmatmul.mubr.msk.f32.vlgmr.msra.gmra.mxu1 %vm479_vm2, %v637_v50  ;;  %v1555_v50 = vld [vmem:[%s2489_s8 + $0x30] sm:$0xff] }
 0x55b   : > { %v1824_v52 = vpop.f32.mrf.mxu1  ;;  %1852 = vmatprep.mubr.msk.f32.mxu1 %vm2080_vm1, %v2079_v8 }
 0x55c   : > { %v1553_v52 = vld [vmem:[%s2489_s8 + $0x20] sm:$0xff] }
 0x55d   : > { %v803_v53 = vpop.f32.mrf.mxu1 }
 0x55e   : > { %1838 = vmatmul.mubr.msk.f32.vlgmr.msra.gmra.mxu0 %vm479_vm2, %v803_v53  ;;  %v1552_v53 = vld [vmem:[%s2489_s8 + $0x18] sm:$0xff] }
 0x55f   : > { %1846 = vmatpush3.xpose.msk.msra.mxu0 %vm479_vm2, %v957_v51  ;;  %v1834_v54 = vpop.f32.mrf.mxu1  ;;  %1847 = vmatprep.mubr.msk.f32.mxu0 %vm2080_vm1, %v2079_v8  ;;  %v1554_v51 = vld [vmem:[%s2489_s8 + $0x28] sm:$0xff] }
 0x560   : > { %1855 = vmatprep.subr.mxu0 %v2079_v8 }
 0x562   : > { %1848 = vmatmul.mubr.msk.f32.vlgmr.msra.gmra.mxu0 %vm479_vm2, %v955_v55 }
 0x563   : > { %1857 = vmatprep.mubr.msk.f32.mxu0 %vm2080_vm1, %v2079_v8  ;;  %1856 = vmatpush3.msra.mxu0 %v1119_v13 }
 0x564   : > { %1865 = vmatprep.subr.mxu0 %v2079_v8 }
 0x61a   : > { %v950_v56 = vpop.f32.mrf.mxu1 }
 0x61c   : > { %v1844_v57 = vpop.f32.mrf.mxu1 }
 0x61e   : > { %v877_v58 = vpop.f32.mrf.mxu0 }
 0x61f   : > { %v951_v59 = vadd.f32 %v950_v56, %v877_v58  ;;  %v1752_v58 = vld [vmem:[%s2486_s5] ss:$0 sm:$0xff] }
 0x620   : > { %v1839_v60 = vpop.f32.mrf.mxu0 }
 0x622   : > { %v1028_v61 = vpop.f32.mrf.mxu0 }
 0x623   : > { %v1032_v62 = vsel %vm479_vm2, %v1028_v61, -inf }
 0x624   : > { %1033 = vmax.xlane.f32.xlu1 %v1032_v62  ;;  %v1849_v63 = vpop.f32.mrf.mxu0  ;;  %v1550_v62 = vld [vmem:[%s2489_s8 + $0x8] sm:$0xff] }
 0x625   : > { %v1549_v63 = vld [vmem:[%s2489_s8] sm:$0xff] }
 0x635   : > { %1043 = vrot.lane.b32.xlu1 %v2290_v19, %s2088_s28 }
 0x639   : > { %1194 = vrot.lane.b32.xlu1 %v2290_v19, %s2089_s29 }
 0x6ad   : > { %v1034_v1 = vpop.xlane.xlu1 %1033 }
 0x6ae   : > { %v1035_v2 = vsub.f32 %v1028_v61, %v1034_v1  ;;  %v1551_v61 = vld [vmem:[%s2489_s8 + $0x10] sm:$0xff]  ;;  %v1753_v1 = vld [vmem:[%s2488_s7] ss:$0 sm:$0xff] }
 0x6b0   : > { %v1036_v3 = vmul.f32 1.442695, %v1035_v2 }
 0x6b1   : > { %v1044_v4 = vpop.permute.xlu1 %1043 }
 0x6b2   : > { %1974 = vpow2.f32 %v1036_v3  ;;  %1851 = vmatpush3.msra.mxu1 %v1044_v4 }
 0x6b3   : > { %1860 = vmatprep.subr.mxu1 %v2079_v8 }
 0x6b5   : > { %v1195_v12 = vpop.permute.xlu1 %1194 }
 0x6bf   : > { %v1975_v5 = vpop.eup %1974 }
 0x6c0   : > { %v1038_v6 = vsel %vm479_vm2, %v1975_v5, 0.0 }
 0x6c1   : > { %1039 = vadd.xlane.f32.xlu0 %v1038_v6  ;;  %v1755_v6 = vld [vmem:[%s2490_s9] ss:$0 sm:$0xff] }
 0x6d7   : > { %1196 = vrot.lane.b32.xlu0 %v2290_v19, %s2090_s21 }
 0x74a   : > { %v1040_v7 = vpop.xlane.xlu0 %1039 }
 0x74b   : > { %1976 = vrcp.f32 %v1040_v7 }
 0x74e   : > { %v1197_v11 = vpop.permute.xlu0 %1196 }
 0x758   : > { %v1977_v9 = vpop.eup %1976 }
 0x759   : > { %v1042_v10 = vmul.f32 %v1977_v9, %v1975_v5 }
 0x75b   : > { %1853 = vmatmul.mubr.msk.f32.vlgmr.msra.gmra.mxu1 %vm479_vm2, %v1042_v10 }
 0x75c   : > { %1861 = vmatpush3.xpose.msk.msra.mxu1 %vm479_vm2, %v1197_v11  ;;  %1862 = vmatprep.mubr.msk.f32.mxu1 %vm2080_vm1, %v2079_v8 }
 0x75d   : > { %1870 = vmatprep.subr.mxu1 %v2079_v8 }
 0x75f   : > { %1863 = vmatmul.mubr.msk.f32.vlgmr.msra.gmra.mxu1 %vm479_vm2, %v1195_v12 }
 0x760   : > { %1872 = vmatprep.mubr.msk.f32.mxu1 %vm2080_vm1, %v2079_v8  ;;  %1871 = vmatpush3.msra.mxu1 %v1359_v25 }
 0x761   : > { %1886 = vmatprep.subr.mxu1 %v2079_v8 }
 0x81b   : > { %v1115_v14 = vpop.f32.mrf.mxu1 }
 0x81c   : > { %1858 = vmatmul.mubr.msk.f32.vlgmr.msra.gmra.mxu0 %vm479_vm2, %v1115_v14 }
 0x81d   : > { %v1854_v15 = vpop.f32.mrf.mxu1  ;;  %1867 = vmatprep.mubr.msk.f32.mxu0 %vm2080_vm1, %v2079_v8 }
 0x81f   : > { %v1268_v16 = vpop.f32.mrf.mxu1 }
 0x820   : > { %v1272_v17 = vsel %vm479_vm2, %v1268_v16, -inf }
 0x821   : > { %1273 = vmax.xlane.f32.xlu1 %v1272_v17  ;;  %v1864_v18 = vpop.f32.mrf.mxu1 }
 0x8aa   : > { %v1274_v20 = vpop.xlane.xlu1 %1273 }
 0x8ab   : > { %v1275_v21 = vsub.f32 %v1268_v16, %v1274_v20 }
 0x8ad   : > { %v1276_v22 = vmul.f32 1.442695, %v1275_v21 }
 0x8af   : > { %1978 = vpow2.f32 %v1276_v22 }
 0x8bc   : > { %v1979_v23 = vpop.eup %1978 }
 0x8bd   : > { %v1278_v24 = vsel %vm479_vm2, %v1979_v23, 0.0 }
 0x8be   : > { %1279 = vadd.xlane.f32.xlu0 %v1278_v24 }
 0x8d4   : > { %1283 = vrot.lane.b32.xlu0 %v2290_v19, %s2091_s24  ;;  %s374_s24 = scalar_lea.vmem [#allocation5], %s1731_s19  ;;  %s2016_s19 = sshll.u32 %s2092_s17, 4  ;;  %s2017_s19 = int_to_ptr.vmem [resolvable:$false] %s2016_s19 }
 0x8d5   : > { %s1655_s20 = sshll.u32 %s374_s24, 4  ;;  %s2018_s28 = scalar_lea.vmem %s2017_s19, 256  ;;  %s1656_s20 = int_to_ptr.vmem [resolvable:$true] %s1655_s20 }
 0x8d6   : > { %s2012_s18 = scalar_lea.vmem %s1656_s20, 128  ;;  %p2019_p3 = scmp.lt.s32.totalorder %s1656_s20, %s2017_s19 }
 0x8d7   : > { %p2013_p11 = scmp.ne.s32.totalorder %s1656_s20, %s2012_s18  ;;  %p2020_p5 = scmp.lt.s32.totalorder %s2018_s28, %s2012_s18 }
 0x8d9   : > { %p2014_p13 = pnand %p2013_p11, %p2508_p12  ;;  %p2021_p8 = por %p2020_p5, %p2019_p3 }
 0x8db   : > { %p2015_p1 = pneg %p2014_p13 }
 0x8dc   : > { %v1189_v26 = vpop.f32.mrf.mxu0 }
 0x8dd   : > { %v1193_v27 = vadd.f32 %v1189_v26, %v951_v59  ;;  %p2022_p10 = pnand %p2021_p8, %p2015_p1 }
 0x8de   : > { %v1859_v28 = vpop.f32.mrf.mxu0 }
 0x947   : > { %v1280_v29 = vpop.xlane.xlu0 %1279 }
 0x948   : > { %1980 = vrcp.f32 %v1280_v29 }
 0x94b   : > { %v1284_v30 = vpop.permute.xlu0 %1283 }
 0x94c   : > { %1866 = vmatpush3.msra.mxu0 %v1284_v30 }
 0x94d   : > { %1875 = vmatprep.subr.mxu0 %v2079_v8 }
 0x955   : > { %v1981_v31 = vpop.eup %1980 }
 0x956   : > { %v1282_v32 = vmul.f32 %v1981_v31, %v1979_v23 }
 0x958   : > { %1868 = vmatmul.mubr.msk.f32.vlgmr.msra.gmra.mxu0 %vm479_vm2, %v1282_v32 }
 0x959   : > { %1883 = vmatprep.mubr.msk.f32.mxu0 %vm2080_vm1, %v2079_v8  ;;  %1876 = vmatpush3.msra.mxu0 %v1467_v46 }
 0x95a   : > { %1877 = vmatprep.subr.mxu0 %v2079_v8 }
 0xa18   : > { %v1355_v19 = vpop.f32.mrf.mxu0 }
 0xa19   : > { %1873 = vmatmul.mubr.msk.f32.vlgmr.msra.gmra.mxu1 %vm479_vm2, %v1355_v19 }
 0xa1a   : > { %v1869_v33 = vpop.f32.mrf.mxu0  ;;  %1902 = vmatprep.mubr.msk.f32.mxu1 %vm2080_vm1, %v2079_v8  ;;  %1887 = vmatpush3.msra.mxu1 %v1556_v49 }
 0xa1b   : > { %1888 = vmatprep.subr.mxu1 %v2079_v8 }
 0xa1c   : > { %1889 = vmatpush3.msra.mxu1 %v1555_v50 }
 0xa1d   : > { %1890 = vmatprep.subr.mxu1 %v2079_v8 }
 0xa1e   : > { %1891 = vmatpush3.msra.mxu1 %v1554_v51 }
 0xa1f   : > { %1892 = vmatprep.subr.mxu1 %v2079_v8 }
 0xa20   : > { %1893 = vmatpush3.msra.mxu1 %v1553_v52 }
 0xa21   : > { %1894 = vmatprep.subr.mxu1 %v2079_v8 }
 0xa22   : > { %1895 = vmatpush3.msra.mxu1 %v1552_v53 }
 0xa23   : > { %1896 = vmatprep.subr.mxu1 %v2079_v8 }
 0xa24   : > { %1897 = vmatpush3.msra.mxu1 %v1551_v61 }
 0xa25   : > { %1898 = vmatprep.subr.mxu1 %v2079_v8 }
 0xa26   : > { %1899 = vmatpush3.msra.mxu1 %v1550_v62 }
 0xa27   : > { %1900 = vmatprep.subr.mxu1 %v2079_v8 }
 0xa28   : > { %1901 = vmatpush3.msra.mxu1 %v1549_v63 }
 0xad9   : > { %v1429_v34 = vpop.f32.mrf.mxu1 }
 0xada   : > { %v1433_v35 = vadd.f32 %v1429_v34, %v1193_v27 }
 0xadb   : > { %v1874_v37 = vpop.f32.mrf.mxu1 }
 0xadc   : > { %v1434_v38 = vadd.f32 %v1433_v35, %v2256_v0  ;;  %v1466_v0 = vld [vmem:[%s2487_s6 + $0x10] sm:$0xff] }
 0xadd   : > { %1878 = vmatpush3.msra.mxu0 %v1466_v0 }
 0xade   : > { %v2380_v39 = vadd.f32 %v1751_v36, %v1434_v38  ;;  %1879 = vmatprep.subr.mxu0 %v2079_v8 }
 0xadf   : > { %1880 = vmatpush3.msra.mxu0 %v1465_v47 }
 0xae0   : > { %v1444_v40 = vsel %vm377_vm0, %v2380_v39, 0.0  ;;  %1881 = vmatprep.subr.mxu0 %v2079_v8 }
 0xae1   : > { %1445 = vadd.xlane.f32.xlu1 %v1444_v40  ;;  %1882 = vmatpush3.msra.mxu0 %v1464_v48 }
 0xb6a   : > { %v1446_v41 = vpop.xlane.xlu1 %1445 }
 0xb6b   : > { %v1447_v42 = vmul.f32 0.03125, %v1446_v41 }
 0xb6d   : > { %v1448_v43 = vsub.f32 %v2380_v39, %v1447_v42 }
 0xb6f   : > { %v1449_v44 = vmul.f32 %v1448_v43, %v1448_v43 }
 0xb71   : > { %v1450_v45 = vsel %vm377_vm0, %v1449_v44, 0.0 }
 0xb72   : > { %1451 = vadd.xlane.f32.xlu1 %v1450_v45 }
 0xbfb   : > { %v1452_v54 = vpop.xlane.xlu1 %1451 }
 0xbfc   : > { %v1453_v55 = vmul.f32 0.03125, %v1452_v54 }
 0xbfe   : > { %v1454_v56 = vadd.f32 1e-05, %v1453_v55 }
 0xc00   : > { %1982 = vrsqrt.f32 %v1454_v56 }
 0xc0d   : > { %v1983_v57 = vpop.eup %1982 }
 0xc0e   : > { %v1456_v59 = vmul.f32 %v1983_v57, %v1448_v43 }
 0xc10   : > { %v1463_v60 = vmul.f32 %v1752_v58, %v1456_v59 }
 0xc12   : > { %1884 = vmatmul.mubr.msk.f32.vlgmr.msra.gmra.mxu0 %vm377_vm0, %v1463_v60  ;;  %v1638_v9 = vadd.f32 %v1463_v60, %v2380_v39 }
 0xcd2   : > { %v1544_v2 = vpop.f32.mrf.mxu0 }
 0xcd3   : > { %v1545_v3 = vadd.f32 %v1753_v1, %v1544_v2 }
 0xcd4   : > { %v1885_v4 = vpop.f32.mrf.mxu0 }
 0xcd5   : > { %v1548_v5 = vmax.f32 %v1545_v3, 0.0 }
 0xcd7   : > { %1903 = vmatmul.mubr.msk.f32.vlgmr.msra.gmra.mxu1 %vm1564_vm3, %v1548_v5 }
 0xd97   : > { %v1634_v7 = vpop.f32.mrf.mxu1 }
 0xd98   : > { %v1635_v8 = vadd.f32 %v1755_v6, %v1634_v7 }
 0xd99   : > { %v1904_v10 = vpop.f32.mrf.mxu1 }
 0xd9a   : > { %v1639_v11 = vadd.f32 %v1638_v9, %v1635_v8 }
 0xd9c   : > { %1640 = vst.msk [vmem:[%s374_s24] sm:$0xff] %vm377_vm0, %v1639_v11 }
 0xd9d   : > { %2025 = shalt.err (!%p2022_p10)
}
 0xd9e   : > { %s2026_s29 = scalar_lea.hbm %s1653_s11, 128  ;;  %s2030_s22 = scalar_lea.hbm %s2491_s10, 256 }
 0xd9f   : > { %p2027_p2 = scmp.ne.s32.totalorder %s1653_s11, %s2026_s29  ;;  %p2031_p7 = scmp.lt.s32.totalorder %s1653_s11, %s2491_s10 }
 0xda0   : > { %p2032_p0 = scmp.lt.s32.totalorder %s2030_s22, %s2026_s29 }
 0xda1   : > { %p2028_p4 = pnand %p2027_p2, %p2508_p12 }
 0xda2   : > { %p2033_p6 = por %p2032_p0, %p2031_p7 }
 0xda3   : > { %p2029_p9 = pneg %p2028_p4 }
 0xda5   : > { %p2034_p11 = pnand %p2033_p6, %p2029_p9 }
 0xda7   : > { %2037 = shalt.err (!%p2034_p11)
}
 0xda8   : > { %1907 = dma.vmem_to_hbm [thread:$0]  (%p2508_p12), %s1656_s20, 128, %s1653_s11, %s1642_s27  }
 0xda9 PF: > { %s1667_s23 = sand.u32 1, %s2064_s13   ;;  %p2509_p13 = scmp.ne.s32.totalorder %s2503_s26, 0 }
 0xdaa   : > { %p2510_p1 = scmp.ge.s32.totalorder %s2076_s16, 2  ;;  %s1668_s30 = scalar_lea.sflag [#allocation4], %s1667_s23 }
 0xdac   : > { %p1914_p3 = pnand %p2510_p1, %p2509_p13 }
 0xdae   : > { %p1915_p5 = pneg %p1914_p3 }
 0xdb0   : > { %2059 = dma.done.wait (%p1915_p5), %s1668_s30, 128  }
 0xdb1   : > { %2061 = vsyncadd (%p1915_p5), %s1668_s30, 4294967168  ;;  %s2511_s16 = sld [smem:[#allocation9_spill]]  ;;  %s2514_s13 = smov %s2068_s14 }
 0xdb2   : > { %s2512_s18 = sld [smem:[#allocation8_spill]] }
 0xdb3   : > { %s2513_s15 = sld [smem:[#allocation10_spill]] }
 0xdb7   : > { %p23_p8 = scmp.ge.s32.totalorder %s2511_s16, 4  }
 0xdb8   : > { %s2515_s14 = smov %s2512_s18 }
 0xdb9   :  { %25 = sbr.rel (!%p23_p8) target bundleno = 5 (0x5), region = 105 }
 0xdbe   :  { %1673 = vsyncpa [#allocation3], 1 }
 0xdbf   :  { %1675 = vsyncpa [#allocation3 + $0x1], 1 }
 0xdc0   :  { %1676 = vsyncpa [#allocation4], 1 }
 0xdc1   :  { %1678 = vsyncpa [#allocation4 + $0x1], 1 }

</bundles_post_ra>
